<compile_context>
chip_gen: v5e
topology: v5e:2x2
jax: 0.10.0
libtpu: 0.0.40
codegen_flags: <defaults>
</compile_context>

<pallas_src>
import jax
import jax.numpy as jnp
from jax.experimental import pallas as pl
from jax.experimental.pallas import tpu as pltpu


def _gcde_kernel(x_ref, w_ref, b_ref, a_ref, out_ref):
    """Fused controlled-GCDE forward: two GCN branches in one matmul pair.

    x_ref : (N, 2D)   [x0 | x1], lane-dense channel-major state
    w_ref : (2D, 2H)  blockdiag(W_l, W_c)
    b_ref : (1, 2H)   [b_l | b_c]
    a_ref : (N, N)    normalized adjacency  diag(norm) @ A @ diag(norm)
    out   : (N, H)
    """
    # Feature projection for both branches in one MXU op -> (N, 2H), f32 acc.
    h_cat = jnp.dot(x_ref[...], w_ref[...], preferred_element_type=jnp.float32)
    # Neighbor aggregation for both branches in one MXU op -> (N, 2H).
    h_agg = jnp.dot(a_ref[...], h_cat.astype(a_ref.dtype),
                    preferred_element_type=jnp.float32)
    # Fused bias + ReLU (VPU).
    h_act = jnp.maximum(h_agg + b_ref[...], 0.0)
    # Branch sum via static two-slice add (both halves sit in the same vregs;
    # no cross-lane op needed, and avoids the sub-vreg pltpu.roll that Mosaic
    # rejected).
    half = out_ref.shape[-1]
    out_ref[...] = (h_act[:, :half] + h_act[:, half:]).astype(out_ref.dtype)


def make_cont_gcde_params(w_l, b_l, w_c, b_c, adj, norm, *,
                          matmul_dtype=jnp.bfloat16):
    """One-time setup: fold degree norm into adjacency, fuse weights/biases.

    Call this ONCE per model / graph; every ODE-function evaluation then
    reuses the returned constants (no per-eval XLA fusions / HBM round trips).
    """
    d, h = w_l.shape
    # Fold symmetric degree normalization into the adjacency:
    #   norm * (A @ (norm * z)) == (diag(norm) @ A @ diag(norm)) @ z
    a_hat = (norm[:, None] * adj * norm[None, :]).astype(matmul_dtype)
    # Block-diagonal weight so both branch projections are one wide matmul.
    # NOTE: neutral at D=H<=128 (one MXU tile either way); for much larger
    # widths switch to two per-branch projections to avoid multiplying zeros.
    zeros = jnp.zeros((d, h), w_l.dtype)
    w_blk = jnp.block([[w_l, zeros], [zeros, w_c]]).astype(matmul_dtype)
    # Concatenated bias, one (1, 2H) ref instead of two (1, H) refs.
    b_cat = jnp.concatenate([b_l, b_c]).reshape(1, 2 * h).astype(jnp.float32)
    return {"a_hat": a_hat, "w_blk": w_blk, "b_cat": b_cat, "hidden_dim": h}


def pack_state(x):
    """(.., D, 2) -> (.., 2D) channel-major [x0 | x1].

    Do this once at the solver call-site and keep the state in this layout;
    the stride-2 (N, D, 2) layout must never reach the kernel.
    """
    assert x.shape[-1] == 2
    lead = x.shape[:-2]
    d = x.shape[-2]
    return jnp.swapaxes(x, -1, -2).reshape(*lead, 2 * d)


def cont_gcde_forward(params, x_packed, t=None):
    """Controlled GCDE forward.

    x_packed: (N, 2D) for a single f(t, x) evaluation, or (B, N, 2D) for a
    batch of evaluations (batch of graph states / stacked solver stages) which
    are amortized over one pallas_call with a 'parallel' grid axis.
    Returns (N, H) or (B, N, H), float32.
    """
    del t  # time-independent vector field
    a_hat = params["a_hat"]
    w_blk = params["w_blk"]
    b_cat = params["b_cat"]
    h = params["hidden_dim"]

    squeeze = x_packed.ndim == 2
    if squeeze:
        x_packed = x_packed[None]
    b, n, dd = x_packed.shape
    x_packed = x_packed.astype(a_hat.dtype)

    itemsize = jnp.dtype(a_hat.dtype).itemsize
    flops = b * (2 * n * dd * (2 * h) + 2 * n * n * (2 * h))
    bytes_accessed = (x_packed.size * itemsize + a_hat.size * itemsize
                      + w_blk.size * itemsize + b_cat.size * 4
                      + b * n * h * 4)

    out = pl.pallas_call(
        _gcde_kernel,
        out_shape=jax.ShapeDtypeStruct((b, n, h), jnp.float32),
        grid=(b,),
        in_specs=[
            # Per-evaluation state block (leading batch dim squeezed away).
            pl.BlockSpec((None, n, dd), lambda i: (i, 0, 0)),
            # Constants: same block every grid step -> stay VMEM-resident.
            pl.BlockSpec((dd, 2 * h), lambda i: (0, 0)),
            pl.BlockSpec((1, 2 * h), lambda i: (0, 0)),
            pl.BlockSpec((n, n), lambda i: (0, 0)),
        ],
        out_specs=pl.BlockSpec((None, n, h), lambda i: (i, 0, 0)),
        compiler_params=pltpu.CompilerParams(
            dimension_semantics=("parallel",)),  # shards across TCs on v7x
        cost_estimate=pl.CostEstimate(flops=flops, transcendentals=0,
                                      bytes_accessed=bytes_accessed),
    )(x_packed, w_blk, b_cat, a_hat)

    return out[0] if squeeze else out


def _reference(x, w_l, b_l, w_c, b_c, adj, norm):
    def gcn(hin, w, b):
        hh = hin @ w
        hh = hh * norm[:, None]
        hh = adj @ hh
        hh = hh * norm[:, None]
        hh = hh + b[None, :]
        return jnp.maximum(hh, 0.0)
    return gcn(x[:, :, 0], w_l, b_l) + gcn(x[:, :, 1], w_c, b_c)


if __name__ == "__main__":
    N = 64            # number of graph nodes
    INPUT_DIM = 32    # equals HIDDEN_DIM for an ODE func (state-preserving)
    HIDDEN_DIM = 32
    B = 8             # batch of ODE-function evaluations (amortized grid axis)

    key = jax.random.PRNGKey(0)
    k_x, k_wl, k_bl, k_wc, k_bc, k_adj, k_xb = jax.random.split(key, 7)

    # Node state with 2 control channels: (N, input_dim, 2)
    x = jax.random.normal(k_x, (N, INPUT_DIM, 2), dtype=jnp.float32)

    # Deterministic GCN parameters.
    w_l = jax.random.normal(k_wl, (INPUT_DIM, HIDDEN_DIM), jnp.float32) * 0.1
    b_l = jax.random.normal(k_bl, (HIDDEN_DIM,), jnp.float32) * 0.1
    w_c = jax.random.normal(k_wc, (INPUT_DIM, HIDDEN_DIM), jnp.float32) * 0.1
    b_c = jax.random.normal(k_bc, (HIDDEN_DIM,), jnp.float32) * 0.1

    # Deterministic random undirected graph with self-loops (dense adjacency).
    rnd = jax.random.uniform(k_adj, (N, N))
    adj = (rnd < 0.15).astype(jnp.float32)
    adj = jnp.maximum(adj, adj.T)                           # symmetric
    adj = jnp.maximum(adj, jnp.eye(N, dtype=jnp.float32))   # self-loops
    deg = adj.sum(axis=1)
    norm = deg ** -0.5                                      # DGL g.ndata['norm']

    ref = _reference(x, w_l, b_l, w_c, b_c, adj, norm)

    # ---- f32 operands: bit-level parity with the f32 reference. ----
    params_f32 = make_cont_gcde_params(w_l, b_l, w_c, b_c, adj, norm,
                                       matmul_dtype=jnp.float32)
    out_f32 = jax.block_until_ready(cont_gcde_forward(params_f32, pack_state(x)))
    assert out_f32.shape == (N, HIDDEN_DIM)
    assert jnp.allclose(out_f32, ref, atol=1e-4, rtol=1e-4)

    # ---- bf16 operands (default): native MXU rate, f32 accumulation. ----
    params_bf16 = make_cont_gcde_params(w_l, b_l, w_c, b_c, adj, norm)
    out_bf16 = jax.block_until_ready(cont_gcde_forward(params_bf16, pack_state(x)))
    assert out_bf16.shape == (N, HIDDEN_DIM)
    assert jnp.allclose(out_bf16, ref, atol=3e-2, rtol=3e-2)

    # ---- Batched evaluations: one pallas_call, 'parallel' grid over B. ----
    xb = jax.random.normal(k_xb, (B, N, INPUT_DIM, 2), dtype=jnp.float32)
    out_b = jax.block_until_ready(cont_gcde_forward(params_f32, pack_state(xb)))
    ref_b = jnp.stack([_reference(xb[i], w_l, b_l, w_c, b_c, adj, norm)
                       for i in range(B)])
    assert out_b.shape == (B, N, HIDDEN_DIM)
    assert jnp.allclose(out_b, ref_b, atol=1e-4, rtol=1e-4)

    print("KERNEL_OK")
</pallas_src>

<mosaic_0001>
module attributes {stable_mosaic.version = 11 : i64} {
  func.func @_gcde_kernel(%arg0: i32, %arg1: memref<1x64x64xf32, #tpu.memory_space<vmem>>, %arg2: memref<64x64xf32, #tpu.memory_space<vmem>>, %arg3: memref<1x64xf32, #tpu.memory_space<vmem>>, %arg4: memref<64x64xf32, #tpu.memory_space<vmem>>, %arg5: memref<1x64x32xf32, #tpu.memory_space<vmem>>) attributes {dimension_semantics = [#tpu.dimension_semantics<parallel>], iteration_bounds = array<i64: 1>, scalar_prefetch = 0 : i64, scratch_operands = 0 : i64, tpu.core_type = #tpu.core_type<tc>, window_params = [{transform_indices = @transform_0, window_bounds = array<i64: 1, 64, 64>}, {pipeline_mode = #tpu.pipeline_mode<synchronous>, transform_indices = @transform_1, window_bounds = array<i64: 64, 64>}, {pipeline_mode = #tpu.pipeline_mode<synchronous>, transform_indices = @transform_2, window_bounds = array<i64: 1, 64>}, {pipeline_mode = #tpu.pipeline_mode<synchronous>, transform_indices = @transform_3, window_bounds = array<i64: 64, 64>}, {transform_indices = @transform_4, window_bounds = array<i64: 1, 64, 32>}]} {
    %c0 = arith.constant 0 : index
    %c0_0 = arith.constant 0 : index
    %c0_1 = arith.constant 0 : index
    %0 = vector.load %arg1[%c0, %c0_0, %c0_1] : memref<1x64x64xf32, #tpu.memory_space<vmem>>, vector<1x64x64xf32>
    %1 = vector.shape_cast %0 : vector<1x64x64xf32> to vector<64x64xf32>
    %c0_2 = arith.constant 0 : index
    %c0_3 = arith.constant 0 : index
    %2 = vector.load %arg2[%c0_2, %c0_3] : memref<64x64xf32, #tpu.memory_space<vmem>>, vector<64x64xf32>
    %cst = arith.constant dense<0.000000e+00> : vector<64x64xf32>
    %3 = tpu.matmul %1, %2, %cst {dimension_numbers = #tpu.dot_dimension_numbers<[1], [0], [0], [1], [0, 0, 1, 1], [], []>} : vector<64x64xf32>, vector<64x64xf32>, vector<64x64xf32> -> vector<64x64xf32>
    %c0_4 = arith.constant 0 : index
    %c0_5 = arith.constant 0 : index
    %4 = vector.load %arg4[%c0_4, %c0_5] : memref<64x64xf32, #tpu.memory_space<vmem>>, vector<64x64xf32>
    %cst_6 = arith.constant dense<0.000000e+00> : vector<64x64xf32>
    %5 = tpu.matmul %4, %3, %cst_6 {dimension_numbers = #tpu.dot_dimension_numbers<[1], [0], [0], [1], [0, 0, 1, 1], [], []>} : vector<64x64xf32>, vector<64x64xf32>, vector<64x64xf32> -> vector<64x64xf32>
    %c0_7 = arith.constant 0 : index
    %c0_8 = arith.constant 0 : index
    %6 = vector.load %arg3[%c0_7, %c0_8] : memref<1x64xf32, #tpu.memory_space<vmem>>, vector<1x64xf32>
    %7 = vector.broadcast %6 : vector<1x64xf32> to vector<64x64xf32>
    %8 = arith.addf %5, %7 : vector<64x64xf32>
    %cst_9 = arith.constant 0.000000e+00 : f32
    %9 = vector.broadcast %cst_9 : f32 to vector<64x64xf32>
    %10 = arith.maximumf %8, %9 : vector<64x64xf32>
    %11 = vector.extract_strided_slice %10 {offsets = [0, 0], sizes = [64, 32], strides = [1, 1]} : vector<64x64xf32> to vector<64x32xf32>
    %12 = vector.extract_strided_slice %10 {offsets = [0, 32], sizes = [64, 32], strides = [1, 1]} : vector<64x64xf32> to vector<64x32xf32>
    %13 = arith.addf %11, %12 : vector<64x32xf32>
    %c0_10 = arith.constant 0 : index
    %c0_11 = arith.constant 0 : index
    %c0_12 = arith.constant 0 : index
    %14 = vector.load %arg5[%c0_10, %c0_11, %c0_12] : memref<1x64x32xf32, #tpu.memory_space<vmem>>, vector<1x64x32xf32>
    %15 = vector.shape_cast %14 : vector<1x64x32xf32> to vector<64x32xf32>
    %16 = vector.shape_cast %13 : vector<64x32xf32> to vector<1x64x32xf32>
    tpu.vector_store %arg5[%c0_10, %c0_11, %c0_12], %16 {strides = array<i32>} : memref<1x64x32xf32, #tpu.memory_space<vmem>>, vector<1x64x32xf32>,
    return
  }
  func.func @transform_0(%arg0: i32) -> (i32, i32, i32) {
    %c0_i32 = arith.constant 0 : i32
    %c0_i32_0 = arith.constant 0 : i32
    %c0_i32_1 = arith.constant 0 : i32
    return %arg0, %c0_i32, %c0_i32_0 : i32, i32, i32
  }
  func.func @transform_1(%arg0: i32) -> (i32, i32) {
    %c0_i32 = arith.constant 0 : i32
    %c0_i32_0 = arith.constant 0 : i32
    %c0_i32_1 = arith.constant 0 : i32
    return %c0_i32, %c0_i32_0 : i32, i32
  }
  func.func @transform_2(%arg0: i32) -> (i32, i32) {
    %c0_i32 = arith.constant 0 : i32
    %c0_i32_0 = arith.constant 0 : i32
    %c0_i32_1 = arith.constant 0 : i32
    return %c0_i32, %c0_i32_0 : i32, i32
  }
  func.func @transform_3(%arg0: i32) -> (i32, i32) {
    %c0_i32 = arith.constant 0 : i32
    %c0_i32_0 = arith.constant 0 : i32
    %c0_i32_1 = arith.constant 0 : i32
    return %c0_i32, %c0_i32_0 : i32, i32
  }
  func.func @transform_4(%arg0: i32) -> (i32, i32, i32) {
    %c0_i32 = arith.constant 0 : i32
    %c0_i32_0 = arith.constant 0 : i32
    %c0_i32_1 = arith.constant 0 : i32
    return %arg0, %c0_i32, %c0_i32_0 : i32, i32, i32
  }
}

</mosaic_0001>

<bundles_post_ra>
// kernel: tpu_custom_call.1
= control target key start
LH: loop header
LB: loop body
LE: loop exit
PB: predicated region body
PF: predicated region fallthrough
CT: control target
= control target key end

     0   :  { %9 = vsyncpa [#allocation3], 0  ;;  %s492_s0 = inlined_call_operand.hbm [shape: f32[1,64,64], index: 0, kind: input, shape index: {}]   ;;  %s493_s1 = inlined_call_operand.hbm [shape: f32[64,64], index: 1, kind: input, shape index: {}]   ;;  %s494_s2 = inlined_call_operand.vmem [shape: f32[1,64], index: 2, kind: input, shape index: {}]   ;;  %s495_s3 = inlined_call_operand.hbm [shape: f32[64,64], index: 3, kind: input, shape index: {}]   ;;  %s496_s4 = inlined_call_operand.vmem [shape: f32[1,64,32], index: 4, kind: output, shape index: {}]  }
   0x1   :  { %10 = vsyncpa [#allocation5], 0  ;;  %s28_s17 = sshll.u32 %s493_s1, 4  ;;  %s401_s18 = smov [#allocation4]   ;;  %s29_s17 = int_to_ptr.hbm [resolvable:$true] %s28_s17 }
   0x2   :  { %s30_s19 = sshll.u32 %s401_s18, 4  ;;  %s15_s22 = sshll.u32 %s492_s0, 4  ;;  %s31_s19 = int_to_ptr.vmem [resolvable:$true] %s30_s19  ;;  %s16_s22 = int_to_ptr.hbm [resolvable:$true] %s15_s22 }
   0x3   :  { %s402_s23 = smov 128   ;;  %s403_s24 = smov 8  }
   0x4   :  { %36 = dma.hbm_to_vmem [thread:$0]  %s29_s17, 1024, %s31_s19, [#allocation5], %s402_s23, %s402_s23, %s403_s24  }
   0x5   :  { %s404_s25 = smov [#allocation2]   ;;  %s43_s29 = sshll.u32 %s495_s3, 4  ;;  %s44_s29 = int_to_ptr.hbm [resolvable:$true] %s43_s29 }
   0x6   :  { %s17_s26 = sshll.u32 %s404_s25, 4  ;;  %s405_s1 = smov [#allocation6]   ;;  %s18_s26 = int_to_ptr.vmem [resolvable:$true] %s17_s26 }
   0x7   :  { %23 = dma.hbm_to_vmem [thread:$0]  %s16_s22, 1024, %s18_s26, [#allocation3], %s402_s23, %s402_s23, %s403_s24  }
   0x8   :  { %s45_s30 = sshll.u32 %s405_s1, 4  ;;  %s46_s30 = int_to_ptr.vmem [resolvable:$true] %s45_s30 }
   0x9   :  { %51 = dma.hbm_to_vmem [thread:$0]  %s44_s29, 1024, %s46_s30, [#allocation5], %s402_s23, %s402_s23, %s403_s24  }
   0xa   :  { %397 = dma.done.wait [#allocation3], 1024  }
   0xb   :  { %398 = vsyncadd [#allocation3], 4294966272 }
   0xc   :  { %399 = dma.done.wait [#allocation5], 2048  }
   0xd   :  { %400 = vsyncadd [#allocation5], 4294965248  ;;  %v79_v0 = vld [vmem:[#allocation4 + $0x38] sm:$0xff]  ;;  %v78_v1 = vld [vmem:[#allocation4 + $0x30] sm:$0xff]  ;;  %vm80_vm0 = vcmask 523264   ;;  %s406_s5 = smov 96  }
   0xe   :  { %302 = vmatpush.msra.mxu2 %v79_v0  ;;  %113 = vmatpush.msra.mxu0 %v79_v0  ;;  %v77_v2 = vld [vmem:[#allocation4 + $0x28] sm:$0xff]  ;;  %v76_v3 = vld [vmem:[#allocation4 + $0x20] sm:$0xff]  ;;  %v75_v4 = vld [vmem:[#allocation4 + $0x18] sm:$0xff]  ;;  %vm271_vm1 = vcmask 261120  }
   0xf   :  { %v74_v5 = vld [vmem:[#allocation4 + $0x10] sm:$0xff]  ;;  %v73_v6 = vld [vmem:[#allocation4 + $0x8] sm:$0xff]  ;;  %v72_v7 = vld [vmem:[#allocation4] sm:$0xff] }
  0x10   :  { %303 = vmatpush.msra.mxu2 %v78_v1  ;;  %114 = vmatpush.msra.mxu0 %v78_v1  ;;  %v68_v8 = vld [vmem:[#allocation2 + $0x20] sm:$0xff]  ;;  %v69_v10 = vld [vmem:[#allocation2 + $0x28] sm:$0xff]  ;;  %v70_v12 = vld [vmem:[#allocation2 + $0x30] sm:$0xff] }
  0x11   :  { %v64_v9 = vld [vmem:[#allocation2] sm:$0xff]  ;;  %v65_v11 = vld [vmem:[#allocation2 + $0x8] sm:$0xff]  ;;  %v66_v13 = vld [vmem:[#allocation2 + $0x10] sm:$0xff] }
  0x12   :  { %304 = vmatpush.msra.mxu2 %v77_v2  ;;  %115 = vmatpush.msra.mxu0 %v77_v2  ;;  %v71_v14 = vld [vmem:[#allocation2 + $0x38] sm:$0xff]  ;;  %v146_v24 = vld [vmem:[#allocation6] sm:$0xff]  ;;  %v147_v26 = vld [vmem:[#allocation6 + $0x8] sm:$0xff] }
  0x13   :  { %v67_v15 = vld [vmem:[#allocation2 + $0x18] sm:$0xff]  ;;  %v150_v25 = vld [vmem:[#allocation6 + $0x20] sm:$0xff]  ;;  %v151_v27 = vld [vmem:[#allocation6 + $0x28] sm:$0xff] }
  0x14   :  { %305 = vmatpush.msra.mxu2 %v76_v3  ;;  %116 = vmatpush.msra.mxu0 %v76_v3  ;;  %v148_v28 = vld [vmem:[#allocation6 + $0x10] sm:$0xff]  ;;  %v149_v30 = vld [vmem:[#allocation6 + $0x18] sm:$0xff]  ;;  %v324_v32 = vld [vmem:[%s494_s2] ss:$0 sm:$0xff] }
  0x15   :  { %v152_v29 = vld [vmem:[#allocation6 + $0x30] sm:$0xff]  ;;  %v153_v31 = vld [vmem:[#allocation6 + $0x38] sm:$0xff] }
  0x16   :  { %306 = vmatpush.msra.mxu2 %v75_v4  ;;  %117 = vmatpush.msra.mxu0 %v75_v4 }
  0x18   :  { %307 = vmatpush.msra.mxu2 %v74_v5  ;;  %118 = vmatpush.msra.mxu0 %v74_v5 }
  0x1a   :  { %308 = vmatpush.msra.mxu2 %v73_v6  ;;  %119 = vmatpush.msra.mxu0 %v73_v6 }
  0x1c   :  { %309 = vmatpush.msra.mxu2 %v72_v7  ;;  %120 = vmatpush.msra.mxu0 %v72_v7 }
  0x1d   :  { %290 = vmatmul.msk.f32.vlgmr.msra.gmra.mxu2 %vm80_vm0, %v68_v8  ;;  %286 = vmatmul.msk.f32.vlgmr.msra.gmra.mxu0 %vm80_vm0, %v64_v9 }
  0x25   :  { %291 = vmatmul.msk.f32.gmra.mxu2 %vm80_vm0, %v69_v10  ;;  %287 = vmatmul.msk.f32.gmra.mxu0 %vm80_vm0, %v65_v11 }
  0x2d   :  { %292 = vmatmul.msk.f32.gmra.mxu2 %vm80_vm0, %v70_v12  ;;  %288 = vmatmul.msk.f32.gmra.mxu0 %vm80_vm0, %v66_v13 }
  0x35   :  { %293 = vmatmul.msk.f32.gmra.mxu2 %vm80_vm0, %v71_v14  ;;  %289 = vmatmul.msk.f32.gmra.mxu0 %vm80_vm0, %v67_v15 }
  0x9a   :  { %v122_v17 = vpop.f32.mrf.mxu0 }
  0xa0   :  { %v134_v16 = vpop.f32.mrf.mxu2 }
  0xa2   :  { %v125_v19 = vpop.f32.mrf.mxu0 }
  0xa8   :  { %v137_v18 = vpop.f32.mrf.mxu2 }
  0xaa   :  { %v128_v21 = vpop.f32.mrf.mxu0 }
  0xb0   :  { %v140_v20 = vpop.f32.mrf.mxu2 }
  0xb2   :  { %v131_v23 = vpop.f32.mrf.mxu0 }
  0xb8   :  { %v143_v22 = vpop.f32.mrf.mxu2 }
  0xb9   :  { %190 = vmatpush.msra.mxu1 %v143_v22  ;;  %310 = vmatpush.msra.mxu3 %v143_v22 }
  0xbb   :  { %191 = vmatpush.msra.mxu1 %v140_v20  ;;  %311 = vmatpush.msra.mxu3 %v140_v20 }
  0xbd   :  { %192 = vmatpush.msra.mxu1 %v137_v18  ;;  %312 = vmatpush.msra.mxu3 %v137_v18 }
  0xbf   :  { %193 = vmatpush.msra.mxu1 %v134_v16  ;;  %313 = vmatpush.msra.mxu3 %v134_v16 }
  0xc1   :  { %194 = vmatpush.msra.mxu1 %v131_v23  ;;  %314 = vmatpush.msra.mxu3 %v131_v23 }
  0xc3   :  { %195 = vmatpush.msra.mxu1 %v128_v21  ;;  %315 = vmatpush.msra.mxu3 %v128_v21 }
  0xc5   :  { %196 = vmatpush.msra.mxu1 %v125_v19  ;;  %316 = vmatpush.msra.mxu3 %v125_v19 }
  0xc7   :  { %197 = vmatpush.msra.mxu1 %v122_v17  ;;  %317 = vmatpush.msra.mxu3 %v122_v17 }
  0xc8   :  { %294 = vmatmul.msk.f32.vlgmr.msra.gmra.mxu1 %vm80_vm0, %v146_v24  ;;  %298 = vmatmul.msk.f32.vlgmr.msra.gmra.mxu3 %vm80_vm0, %v150_v25 }
  0xd0   :  { %295 = vmatmul.msk.f32.gmra.mxu1 %vm80_vm0, %v147_v26  ;;  %299 = vmatmul.msk.f32.gmra.mxu3 %vm80_vm0, %v151_v27 }
  0xd8   :  { %296 = vmatmul.msk.f32.gmra.mxu1 %vm80_vm0, %v148_v28  ;;  %300 = vmatmul.msk.f32.gmra.mxu3 %vm80_vm0, %v152_v29 }
  0xe0   :  { %297 = vmatmul.msk.f32.gmra.mxu1 %vm80_vm0, %v149_v30  ;;  %301 = vmatmul.msk.f32.gmra.mxu3 %vm80_vm0, %v153_v31 }
 0x145   :  { %v199_v33 = vpop.f32.mrf.mxu1 }
 0x146   :  { %v200_v34 = vadd.f32 %v324_v32, %v199_v33 }
 0x148   :  { %v223_v35 = vmax.f32 %v200_v34, 0.0 }
 0x14a   :  { %239 = vrot.lane.b32.xlu0 %v223_v35, %s406_s5 }
 0x14b   :  { %v211_v36 = vpop.f32.mrf.mxu3 }
 0x14c   :  { %v212_v37 = vadd.f32 %v324_v32, %v211_v36 }
 0x14d   :  { %v202_v38 = vpop.f32.mrf.mxu1 }
 0x14e   :  { %v227_v39 = vmax.f32 %v212_v37, 0.0  ;;  %v203_v40 = vadd.f32 %v324_v32, %v202_v38 }
 0x150   :  { %v224_v41 = vmax.f32 %v203_v40, 0.0  ;;  %247 = vrot.lane.b32.xlu2 %v227_v39, %s406_s5 }
 0x152   :  { %241 = vrot.lane.b32.xlu0 %v224_v41, %s406_s5 }
 0x153   :  { %v214_v42 = vpop.f32.mrf.mxu3 }
 0x154   :  { %v215_v43 = vadd.f32 %v324_v32, %v214_v42 }
 0x155   :  { %v205_v44 = vpop.f32.mrf.mxu1 }
 0x156   :  { %v228_v45 = vmax.f32 %v215_v43, 0.0  ;;  %v206_v46 = vadd.f32 %v324_v32, %v205_v44 }
 0x158   :  { %v225_v47 = vmax.f32 %v206_v46, 0.0  ;;  %249 = vrot.lane.b32.xlu2 %v228_v45, %s406_s5 }
 0x15a   :  { %243 = vrot.lane.b32.xlu1 %v225_v47, %s406_s5 }
 0x15b   :  { %v217_v48 = vpop.f32.mrf.mxu3 }
 0x15c   :  { %v218_v49 = vadd.f32 %v324_v32, %v217_v48 }
 0x15d   :  { %v208_v50 = vpop.f32.mrf.mxu1 }
 0x15e   :  { %v229_v51 = vmax.f32 %v218_v49, 0.0  ;;  %v209_v52 = vadd.f32 %v324_v32, %v208_v50 }
 0x160   :  { %v226_v53 = vmax.f32 %v209_v52, 0.0  ;;  %251 = vrot.lane.b32.xlu0 %v229_v51, %s406_s5 }
 0x162   :  { %245 = vrot.lane.b32.xlu1 %v226_v53, %s406_s5 }
 0x163   :  { %v220_v54 = vpop.f32.mrf.mxu3 }
 0x164   :  { %v221_v55 = vadd.f32 %v324_v32, %v220_v54 }
 0x166   :  { %v230_v56 = vmax.f32 %v221_v55, 0.0 }
 0x16a   :  { %253 = vrot.lane.b32.xlu1 %v230_v56, %s406_s5 }
 0x1aa   :  { %v248_v57 = vpop.permute.xlu2 %247 }
 0x1ab   :  { %v267_v58 = vadd.f32 %v248_v57, %v227_v39 }
 0x1ad   :  { %276 = vst.msk [vmem:[%s496_s4 + $0x20] sm:$0xff] %vm271_vm1, %v267_v58 }
 0x1b2   :  { %v250_v59 = vpop.permute.xlu2 %249 }
 0x1b3   :  { %v268_v60 = vadd.f32 %v250_v59, %v228_v45 }
 0x1b5   :  { %277 = vst.msk [vmem:[%s496_s4 + $0x28] sm:$0xff] %vm271_vm1, %v268_v60 }
 0x1bc   :  { %v240_v61 = vpop.permute.xlu0 %239 }
 0x1bd   :  { %v263_v62 = vadd.f32 %v240_v61, %v223_v35 }
 0x1bf   :  { %272 = vst.msk [vmem:[%s496_s4] sm:$0xff] %vm271_vm1, %v263_v62 }
 0x1c4   :  { %v242_v63 = vpop.permute.xlu0 %241 }
 0x1c5   :  { %v264_v0 = vadd.f32 %v242_v63, %v224_v41 }
 0x1c7   :  { %273 = vst.msk [vmem:[%s496_s4 + $0x8] sm:$0xff] %vm271_vm1, %v264_v0 }
 0x1cc   :  { %v244_v1 = vpop.permute.xlu1 %243 }
 0x1cd   :  { %v265_v2 = vadd.f32 %v244_v1, %v225_v47 }
 0x1cf   :  { %274 = vst.msk [vmem:[%s496_s4 + $0x10] sm:$0xff] %vm271_vm1, %v265_v2 }
 0x1d2   :  { %v252_v3 = vpop.permute.xlu0 %251 }
 0x1d3   :  { %v269_v4 = vadd.f32 %v252_v3, %v229_v51 }
 0x1d4   :  { %v246_v5 = vpop.permute.xlu1 %245 }
 0x1d5   :  { %278 = vst.msk [vmem:[%s496_s4 + $0x30] sm:$0xff] %vm271_vm1, %v269_v4  ;;  %v266_v6 = vadd.f32 %v246_v5, %v226_v53 }
 0x1d7   :  { %275 = vst.msk [vmem:[%s496_s4 + $0x18] sm:$0xff] %vm271_vm1, %v266_v6 }
 0x1dc   :  { %v254_v7 = vpop.permute.xlu1 %253 }
 0x1dd   :  { %v270_v8 = vadd.f32 %v254_v7, %v230_v56 }
 0x1df   :  { %279 = vst.msk [vmem:[%s496_s4 + $0x38] sm:$0xff] %vm271_vm1, %v270_v8 }
 0x1e0   :  { %284 = vsyncpa [#allocation3], 1 }
 0x1e1   :  { %285 = vsyncpa [#allocation5], 1 }

</bundles_post_ra>
